<compile_context>
chip_gen: v6e
topology: v6e:2x2x1
jax: 0.10.0
libtpu: 0.0.40
codegen_flags: <defaults>
</compile_context>

<pallas_src>
import functools

import jax
import jax.numpy as jnp
from jax import lax
from jax.experimental import pallas as pl
from jax.experimental.pallas import tpu as pltpu


def _patch_expand_kernel(x_ref, w_ref, g_ref, b_ref, o_ref, *, group_size, eps):
    # x_ref: (C, S_TILE)    input; channels on sublanes, (b,h,w) flattened on lanes
    # w_ref: (2C, C)        expand weight, rows permuted to (cc, p1, p2) order
    # g_ref, b_ref: (2C, 1) LayerNorm affine, expanded to the permuted row order
    # o_ref: (2C, S_TILE)   output rows: r = cc*4 + (p1*2 + p2)
    x = x_ref[...]
    w = w_ref[...]
    gamma = g_ref[...]
    beta = b_ref[...]

    # expand Linear (bias-free): single lane-dense matmul, f32 accumulation.
    y = jnp.dot(w, x, preferred_element_type=jnp.float32)        # (2C, S_TILE)

    # Grouped LayerNorm over the `cc` axis.  Row r = cc*4 + q, so the per-pixel
    # group statistics for all four quadrants q are elementwise accumulations of
    # contiguous 4-row slices (pure VPU, no cross-lane reductions).
    inv_g = 1.0 / group_size
    acc = y[0:4, :]
    for cc in range(1, group_size):
        acc = acc + y[cc * 4:(cc + 1) * 4, :]
    mu = acc * inv_g                                              # (4, S_TILE)

    vacc = jnp.square(y[0:4, :] - mu)
    for cc in range(1, group_size):
        vacc = vacc + jnp.square(y[cc * 4:(cc + 1) * 4, :] - mu)
    rstd = lax.rsqrt(vacc * inv_g + eps)                          # (4, S_TILE)

    # Broadcast stats back to all 2C rows and do ONE dense, unmasked store.
    mu_f = jnp.tile(mu, (group_size, 1))                          # (2C, S_TILE)
    rstd_f = jnp.tile(rstd, (group_size, 1))                      # (2C, S_TILE)
    o_ref[...] = (y - mu_f) * rstd_f * gamma + beta


def patch_expand(x_nchw, params, *, eps=1e-5, max_spatial_tile=1024):
    """PatchExpand forward. x_nchw: (B, C, H, W) -> (B, C//2, 2H, 2W)."""
    B, C, H, W = x_nchw.shape
    assert C % 2 == 0, "PatchExpand(dim_scale=2) requires an even channel count"
    gs = C // 2
    two_c = 2 * C

    w_pt = params["expand_w"]            # (2C, C)  PyTorch nn.Linear weight
    gamma = params["norm_w"]             # (C//2,)
    beta = params["norm_b"]              # (C//2,)

    # ---- one-time layout prep in the wrapper (XLA reshapes/transposes) ----
    # reorder weight rows (p1, p2, cc) -> (cc, p1, p2): groups become contiguous
    # 4-row blocks with a fixed quadrant position q = p1*2 + p2 inside each block.
    w_k = w_pt.reshape(2, 2, gs, C).transpose(2, 0, 1, 3).reshape(two_c, C)
    w_k = w_k.astype(jnp.float32)
    g_rows = jnp.repeat(gamma, 4).reshape(two_c, 1).astype(jnp.float32)
    b_rows = jnp.repeat(beta, 4).reshape(two_c, 1).astype(jnp.float32)

    # batch + spatial go to the lane axis -> lane-dense matmul and stores.
    s_total = B * H * W
    x_k = x_nchw.astype(jnp.float32).reshape(B, C, H * W)
    x_k = x_k.transpose(1, 0, 2).reshape(C, s_total)

    s_tile = min(max_spatial_tile, pl.cdiv(s_total, 128) * 128)
    s_pad = pl.cdiv(s_total, s_tile) * s_tile
    if s_pad != s_total:
        x_k = jnp.pad(x_k, ((0, 0), (0, s_pad - s_total)))

    kernel = functools.partial(_patch_expand_kernel, group_size=gs, eps=eps)

    out = pl.pallas_call(
        kernel,
        out_shape=jax.ShapeDtypeStruct((two_c, s_pad), jnp.float32),
        grid=(s_pad // s_tile,),
        in_specs=[
            pl.BlockSpec((C, s_tile), lambda s: (0, s)),       # activations
            pl.BlockSpec((two_c, C), lambda s: (0, 0)),        # expand weight
            pl.BlockSpec((two_c, 1), lambda s: (0, 0)),        # LN gamma (rows)
            pl.BlockSpec((two_c, 1), lambda s: (0, 0)),        # LN beta  (rows)
        ],
        out_specs=pl.BlockSpec((two_c, s_tile), lambda s: (0, s)),
        compiler_params=pltpu.CompilerParams(
            dimension_semantics=("parallel",)),
    )(x_k, w_k, g_rows, b_rows)

    # ---- undo the layout: rows (cc,p1,p2), lanes (b,h,w) -> NCHW (B, C//2, 2H, 2W)
    o = out[:, :s_total].reshape(gs, 2, 2, B, H, W)
    o = o.transpose(3, 0, 4, 1, 5, 2).reshape(B, gs, 2 * H, 2 * W)
    return o


def reference(x, params, eps=1e-5):
    """Pure-JAX mirror of the PyTorch PatchExpand forward (correctness check)."""
    B, C, H, W = x.shape
    gs = C // 2
    xh = jnp.transpose(x, (0, 2, 3, 1)).reshape(B, H * W, C)
    y = xh @ params["expand_w"].T                               # (B, HW, 2C)
    y = y.reshape(B, H, W, 2, 2, gs)                            # (b,h,w,p1,p2,c)
    y = jnp.transpose(y, (0, 1, 3, 2, 4, 5)).reshape(B, 2 * H, 2 * W, gs)
    mu = y.mean(axis=-1, keepdims=True)
    var = jnp.mean(jnp.square(y - mu), axis=-1, keepdims=True)
    yn = (y - mu) * lax.rsqrt(var + eps) * params["norm_w"] + params["norm_b"]
    return jnp.transpose(yn, (0, 3, 1, 2))


if __name__ == "__main__":
    key = jax.random.PRNGKey(0)
    kx, kw, kg, kb = jax.random.split(key, 4)

    B, C, H, W = 2, 4, 16, 16
    x = jax.random.normal(kx, (B, C, H, W), jnp.float32)
    params = dict(
        expand_w=0.25 * jax.random.normal(kw, (2 * C, C), jnp.float32),  # Linear(C, 2C, bias=False).weight
        norm_w=1.0 + 0.1 * jax.random.normal(kg, (C // 2,), jnp.float32),
        norm_b=0.1 * jax.random.normal(kb, (C // 2,), jnp.float32),
    )

    out = patch_expand(x, params)
    out = jax.block_until_ready(out)

    ref = reference(x, params)
    assert out.shape == (B, C // 2, 2 * H, 2 * W)
    if not jnp.allclose(out, ref, rtol=1e-4, atol=1e-4):
        raise AssertionError("Pallas PatchExpand kernel does not match reference")
    print("KERNEL_OK")
</pallas_src>

<mosaic_0001>
module attributes {stable_mosaic.version = 11 : i64} {
  func.func @_patch_expand_kernel(%arg0: i32, %arg1: memref<4x512xf32, #tpu.memory_space<vmem>>, %arg2: memref<8x4xf32, #tpu.memory_space<vmem>>, %arg3: memref<8x1xf32, #tpu.memory_space<vmem>>, %arg4: memref<8x1xf32, #tpu.memory_space<vmem>>, %arg5: memref<8x512xf32, #tpu.memory_space<vmem>>) attributes {dimension_semantics = [#tpu.dimension_semantics<parallel>], iteration_bounds = array<i64: 1>, scalar_prefetch = 0 : i64, scratch_operands = 0 : i64, tpu.core_type = #tpu.core_type<tc>, window_params = [{transform_indices = @transform_0, window_bounds = array<i64: 4, 512>}, {pipeline_mode = #tpu.pipeline_mode<synchronous>, transform_indices = @transform_1, window_bounds = array<i64: 8, 4>}, {pipeline_mode = #tpu.pipeline_mode<synchronous>, transform_indices = @transform_2, window_bounds = array<i64: 8, 1>}, {pipeline_mode = #tpu.pipeline_mode<synchronous>, transform_indices = @transform_3, window_bounds = array<i64: 8, 1>}, {transform_indices = @transform_4, window_bounds = array<i64: 8, 512>}]} {
    %c0 = arith.constant 0 : index
    %c0_0 = arith.constant 0 : index
    %0 = vector.load %arg1[%c0, %c0_0] : memref<4x512xf32, #tpu.memory_space<vmem>>, vector<4x512xf32>
    %c0_1 = arith.constant 0 : index
    %c0_2 = arith.constant 0 : index
    %1 = vector.load %arg2[%c0_1, %c0_2] : memref<8x4xf32, #tpu.memory_space<vmem>>, vector<8x4xf32>
    %c0_3 = arith.constant 0 : index
    %c0_4 = arith.constant 0 : index
    %2 = vector.load %arg3[%c0_3, %c0_4] : memref<8x1xf32, #tpu.memory_space<vmem>>, vector<8x1xf32>
    %c0_5 = arith.constant 0 : index
    %c0_6 = arith.constant 0 : index
    %3 = vector.load %arg4[%c0_5, %c0_6] : memref<8x1xf32, #tpu.memory_space<vmem>>, vector<8x1xf32>
    %cst = arith.constant dense<0.000000e+00> : vector<8x512xf32>
    %4 = tpu.matmul %1, %0, %cst {dimension_numbers = #tpu.dot_dimension_numbers<[1], [0], [0], [1], [0, 0, 1, 1], [], []>} : vector<8x4xf32>, vector<4x512xf32>, vector<8x512xf32> -> vector<8x512xf32>
    %5 = vector.extract_strided_slice %4 {offsets = [0, 0], sizes = [4, 512], strides = [1, 1]} : vector<8x512xf32> to vector<4x512xf32>
    %6 = vector.extract_strided_slice %4 {offsets = [4, 0], sizes = [4, 512], strides = [1, 1]} : vector<8x512xf32> to vector<4x512xf32>
    %7 = arith.addf %5, %6 : vector<4x512xf32>
    %cst_7 = arith.constant 5.000000e-01 : f32
    %8 = vector.broadcast %cst_7 : f32 to vector<4x512xf32>
    %9 = arith.mulf %7, %8 : vector<4x512xf32>
    %10 = vector.extract_strided_slice %4 {offsets = [0, 0], sizes = [4, 512], strides = [1, 1]} : vector<8x512xf32> to vector<4x512xf32>
    %11 = arith.subf %10, %9 : vector<4x512xf32>
    %12 = arith.mulf %11, %11 : vector<4x512xf32>
    %13 = vector.extract_strided_slice %4 {offsets = [4, 0], sizes = [4, 512], strides = [1, 1]} : vector<8x512xf32> to vector<4x512xf32>
    %14 = arith.subf %13, %9 : vector<4x512xf32>
    %15 = arith.mulf %14, %14 : vector<4x512xf32>
    %16 = arith.addf %12, %15 : vector<4x512xf32>
    %cst_8 = arith.constant 5.000000e-01 : f32
    %17 = vector.broadcast %cst_8 : f32 to vector<4x512xf32>
    %18 = arith.mulf %16, %17 : vector<4x512xf32>
    %cst_9 = arith.constant 9.99999974E-6 : f32
    %19 = vector.broadcast %cst_9 : f32 to vector<4x512xf32>
    %20 = arith.addf %18, %19 : vector<4x512xf32>
    %21 = math.rsqrt %20 : vector<4x512xf32>
    %22 = tpu.concatenate %9, %9 in 0 : vector<4x512xf32>, vector<4x512xf32> -> vector<8x512xf32>
    %23 = tpu.concatenate %21, %21 in 0 : vector<4x512xf32>, vector<4x512xf32> -> vector<8x512xf32>
    %24 = arith.subf %4, %22 : vector<8x512xf32>
    %25 = arith.mulf %24, %23 : vector<8x512xf32>
    %26 = vector.broadcast %2 : vector<8x1xf32> to vector<8x512xf32>
    %27 = arith.mulf %25, %26 : vector<8x512xf32>
    %28 = vector.broadcast %3 : vector<8x1xf32> to vector<8x512xf32>
    %29 = arith.addf %27, %28 : vector<8x512xf32>
    %c0_10 = arith.constant 0 : index
    %c0_11 = arith.constant 0 : index
    %30 = vector.load %arg5[%c0_10, %c0_11] : memref<8x512xf32, #tpu.memory_space<vmem>>, vector<8x512xf32>
    tpu.vector_store %arg5[%c0_10, %c0_11], %29 {strides = array<i32>} : memref<8x512xf32, #tpu.memory_space<vmem>>, vector<8x512xf32>,
    return
  }
  func.func @transform_0(%arg0: i32) -> (i32, i32) {
    %c0_i32 = arith.constant 0 : i32
    %c0_i32_0 = arith.constant 0 : i32
    return %c0_i32, %arg0 : i32, i32
  }
  func.func @transform_1(%arg0: i32) -> (i32, i32) {
    %c0_i32 = arith.constant 0 : i32
    %c0_i32_0 = arith.constant 0 : i32
    %c0_i32_1 = arith.constant 0 : i32
    return %c0_i32, %c0_i32_0 : i32, i32
  }
  func.func @transform_2(%arg0: i32) -> (i32, i32) {
    %c0_i32 = arith.constant 0 : i32
    %c0_i32_0 = arith.constant 0 : i32
    %c0_i32_1 = arith.constant 0 : i32
    return %c0_i32, %c0_i32_0 : i32, i32
  }
  func.func @transform_3(%arg0: i32) -> (i32, i32) {
    %c0_i32 = arith.constant 0 : i32
    %c0_i32_0 = arith.constant 0 : i32
    %c0_i32_1 = arith.constant 0 : i32
    return %c0_i32, %c0_i32_0 : i32, i32
  }
  func.func @transform_4(%arg0: i32) -> (i32, i32) {
    %c0_i32 = arith.constant 0 : i32
    %c0_i32_0 = arith.constant 0 : i32
    return %c0_i32, %arg0 : i32, i32
  }
}

</mosaic_0001>

<bundles_post_ra>
// kernel: tpu_custom_call.1
= control target key start
LH: loop header
LB: loop body
LE: loop exit
PB: predicated region body
PF: predicated region fallthrough
CT: control target
= control target key end

     0   :  { %vm31_vm0 = vcmask 1043456   ;;  %v364_v4 = vmov 0.0   ;;  %s450_s0 = inlined_call_operand.vmem [shape: f32[4,512], index: 0, kind: input, shape index: {}]   ;;  %s451_s1 = inlined_call_operand.vmem [shape: f32[8,4], index: 1, kind: input, shape index: {}]   ;;  %s452_s2 = inlined_call_operand.vmem [shape: f32[8,1], index: 2, kind: input, shape index: {}]   ;;  %s453_s3 = inlined_call_operand.vmem [shape: f32[8,1], index: 3, kind: input, shape index: {}]   ;;  %s454_s4 = inlined_call_operand.hbm [shape: f32[8,512], index: 4, kind: output, shape index: {}]  }
   0x1   :  { %v18_v0 = vld [vmem:[%s450_s0] sm:$0xff]  ;;  %v19_v1 = vld [vmem:[%s450_s0 + $0x8] sm:$0xff]  ;;  %104 = vmatprep.mubr.f32.mxu0 %v364_v4  ;;  %175 = vmatprep.mubr.f32.mxu1 %v364_v4 }
   0x2   :  { %v25_v2 = vcombine.high %v18_v0, %v18_v0  ;;  %v26_v3 = vcombine.high %v19_v1, %v19_v1 }
   0x3   :  { %9 = vsyncpa [#allocation3], 0  ;;  %v20_v5 = vld [vmem:[%s451_s1] sm:$0xff]  ;;  %vm27_vm1 = vcmask 31744   ;;  %v365_v6 = vmov 0  }
   0x4   :  { %331 = vset.pattern.permute.xlu0 %v365_v6  ;;  %322 = vmatprep.subr.msk.mxu0 %vm31_vm0, %v25_v2  ;;  %v21_v7 = vld [vmem:[%s452_s2] sm:$0xff]  ;;  %s366_s2 = smov [#allocation2]  }
   0x5   :  { %325 = vmatprep.subr.msk.mxu1 %vm31_vm0, %v26_v3  ;;  %323 = vmatpush1.msk.msra.mxu0 %vm31_vm0, %v18_v0  ;;  %v22_v8 = vld [vmem:[%s453_s3] sm:$0xff]  ;;  %s314_s3 = sshll.u32 %s366_s2, 4  ;;  %s315_s3 = int_to_ptr.vmem [resolvable:$true] %s314_s3 }
   0x6   :  { %326 = vmatpush1.msk.msra.mxu1 %vm31_vm0, %v19_v1  ;;  %324 = vmatmul.mubr.msk.f32.vlgmr.msra.gmra.mxu0 %vm27_vm1, %v20_v5  ;;  %s342_s23 = scalar_lea.vmem %s315_s3, 512  ;;  %p347_p1 = scmp.lt.s32.totalorder %s315_s3, %s315_s3 }
   0x7   :  { %327 = vmatmul.mubr.msk.f32.vlgmr.msra.gmra.mxu1 %vm27_vm1, %v20_v5  ;;  %288 = vperm.xlu0 %331, %v21_v7   ;;  %p343_p0 = scmp.ne.s32.totalorder %s315_s3, %s342_s23  ;;  %p348_p2 = scmp.lt.s32.totalorder %s342_s23, %s342_s23 }
   0x9   :  { %p349_p3 = por %p348_p2, %p347_p1 }
   0xb   :  { %297 = vperm.xlu0 %331, %v22_v8   ;;  %p350_p4 = pnand %p349_p3, %p343_p0 }
  0x82   :  { %v289_v1 = vpop.permute.xlu0 %288 }
  0xc6   :  { %v411_v9 = vpop.f32.mrf.mxu0 }
  0xc7   :  { %v413_v10 = vpop.f32.mrf.mxu1  ;;  %v186_v11 = vrot.slane %v411_v9, 4 }
  0xc8   :  { %v188_v12 = vrot.slane %v413_v10, 4  ;;  %v417_v13 = vpop.f32.mrf.mxu0 }
  0xc9   :  { %v419_v14 = vpop.f32.mrf.mxu1  ;;  %v194_v15 = vadd.f32 %v186_v11, %v411_v9  ;;  %v187_v17 = vrot.slane %v417_v13, 4 }
  0xca   :  { %v196_v16 = vadd.f32 %v188_v12, %v413_v10  ;;  %v189_v18 = vrot.slane %v419_v14, 4 }
  0xcb   :  { %v198_v19 = vmul.f32 0.5, %v194_v15  ;;  %v195_v21 = vadd.f32 %v187_v17, %v417_v13 }
  0xcc   :  { %v200_v20 = vmul.f32 0.5, %v196_v16  ;;  %v197_v22 = vadd.f32 %v189_v18, %v419_v14 }
  0xcd   :  { %v214_v23 = vrot.slane %v198_v19, 4  ;;  %v199_v25 = vmul.f32 0.5, %v195_v21  ;;  %v202_v27 = vsub.f32 %v411_v9, %v198_v19 }
  0xce   :  { %v216_v24 = vrot.slane %v200_v20, 4  ;;  %v201_v26 = vmul.f32 0.5, %v197_v22  ;;  %v204_v29 = vsub.f32 %v413_v10, %v200_v20 }
  0xcf   :  { %v222_v28 = vsub.f32 %v411_v9, %v214_v23  ;;  %v215_v32 = vrot.slane %v199_v25, 4  ;;  %v206_v35 = vmul.f32 %v202_v27, %v202_v27  ;;  %v203_v37 = vsub.f32 %v417_v13, %v199_v25 }
  0xd0   :  { %v224_v30 = vsub.f32 %v413_v10, %v216_v24  ;;  %v217_v34 = vrot.slane %v201_v26, 4  ;;  %v208_v39 = vmul.f32 %v204_v29, %v204_v29  ;;  %v205_v41 = vsub.f32 %v419_v14, %v201_v26 }
  0xd1   :  { %v226_v31 = vmul.f32 %v222_v28, %v222_v28  ;;  %v223_v38 = vsub.f32 %v417_v13, %v215_v32  ;;  %v207_v48 = vmul.f32 %v203_v37, %v203_v37  ;;  %v258_v61 = vsel %vm31_vm0, %v198_v19, %v214_v23 }
  0xd2   :  { %v228_v33 = vmul.f32 %v224_v30, %v224_v30  ;;  %v225_v42 = vsub.f32 %v419_v14, %v217_v34  ;;  %v209_v51 = vmul.f32 %v205_v41, %v205_v41  ;;  %v260_v63 = vsel %vm31_vm0, %v200_v20, %v216_v24 }
  0xd3   :  { %v234_v36 = vrot.slane %v226_v31, 4  ;;  %v227_v44 = vmul.f32 %v223_v38, %v223_v38  ;;  %v278_v3 = vsub.f32 %v411_v9, %v258_v61  ;;  %v280_v5 = vsub.f32 %v413_v10, %v260_v63  ;;  %v298_v10 = vpop.permute.xlu0 %297 }
  0xd4   :  { %v236_v40 = vrot.slane %v228_v33, 4  ;;  %v229_v46 = vmul.f32 %v225_v42, %v225_v42  ;;  %v259_v6 = vsel %vm31_vm0, %v199_v25, %v215_v32  ;;  %v261_v11 = vsel %vm31_vm0, %v201_v26, %v217_v34 }
  0xd5   :  { %v242_v43 = vadd.f32 %v234_v36, %v206_v35  ;;  %v235_v49 = vrot.slane %v227_v44, 4  ;;  %v279_v19 = vsub.f32 %v417_v13, %v259_v6  ;;  %v281_v21 = vsub.f32 %v419_v14, %v261_v11 }
  0xd6   :  { %v244_v45 = vadd.f32 %v236_v40, %v208_v39  ;;  %v237_v52 = vrot.slane %v229_v46, 4 }
  0xd7   :  { %v246_v47 = vmul.f32 0.5, %v242_v43  ;;  %v243_v54 = vadd.f32 %v235_v49, %v207_v48 }
  0xd8   :  { %v248_v50 = vmul.f32 0.5, %v244_v45  ;;  %v245_v56 = vadd.f32 %v237_v52, %v209_v51 }
  0xd9   :  { %v250_v53 = vadd.f32 1e-05, %v246_v47  ;;  %v247_v57 = vmul.f32 0.5, %v243_v54 }
  0xda   :  { %v252_v55 = vadd.f32 1e-05, %v248_v50  ;;  %v249_v58 = vmul.f32 0.5, %v245_v56 }
  0xdb   :  { %334 = vrsqrt.f32 %v250_v53  ;;  %v251_v59 = vadd.f32 1e-05, %v247_v57 }
  0xdc   :  { %336 = vrsqrt.f32 %v252_v55  ;;  %v253_v60 = vadd.f32 1e-05, %v249_v58 }
  0xdd   :  { %338 = vrsqrt.f32 %v251_v59 }
  0xde   :  { %340 = vrsqrt.f32 %v253_v60 }
  0xe8   :  { %v335_v62 = vpop.eup %334 }
  0xe9   :  { %v337_v0 = vpop.eup %336  ;;  %v266_v2 = vrot.slane %v335_v62, 4 }
  0xea   :  { %v268_v4 = vrot.slane %v337_v0, 4  ;;  %v339_v8 = vpop.eup %338 }
  0xeb   :  { %v274_v7 = vsel %vm31_vm0, %v335_v62, %v266_v2  ;;  %v341_v16 = vpop.eup %340  ;;  %v267_v17 = vrot.slane %v339_v8, 4 }
  0xec   :  { %v276_v12 = vsel %vm31_vm0, %v337_v0, %v268_v4  ;;  %v282_v15 = vmul.f32 %v278_v3, %v274_v7  ;;  %v269_v20 = vrot.slane %v341_v16, 4 }
  0xed   :  { %v284_v18 = vmul.f32 %v280_v5, %v276_v12  ;;  %v275_v22 = vsel %vm31_vm0, %v339_v8, %v267_v17 }
  0xee   :  { %v291_v9 = vmul.f32 %v289_v1, %v282_v15  ;;  %v277_v24 = vsel %vm31_vm0, %v341_v16, %v269_v20  ;;  %v283_v25 = vmul.f32 %v279_v19, %v275_v22 }
  0xef   :  { %v293_v23 = vmul.f32 %v289_v1, %v284_v18  ;;  %v285_v27 = vmul.f32 %v281_v21, %v277_v24 }
  0xf0   :  { %v300_v26 = vadd.f32 %v298_v10, %v291_v9  ;;  %v292_v29 = vmul.f32 %v289_v1, %v283_v25 }
  0xf1   :  { %v302_v28 = vadd.f32 %v298_v10, %v293_v23  ;;  %v294_v30 = vmul.f32 %v289_v1, %v285_v27 }
  0xf2   :  { %304 = vst [vmem:[#allocation2] sm:$0xff] %v300_v26  ;;  %v301_v13 = vadd.f32 %v298_v10, %v292_v29 }
  0xf3   :  { %306 = vst [vmem:[#allocation2 + $0x10] sm:$0xff] %v302_v28  ;;  %v303_v31 = vadd.f32 %v298_v10, %v294_v30 }
  0xf4   :  { %305 = vst [vmem:[#allocation2 + $0x8] sm:$0xff] %v301_v13 }
  0xf5   :  { %307 = vst [vmem:[#allocation2 + $0x18] sm:$0xff] %v303_v31 }
  0xf6   :  { %353 = shalt.err (!%p350_p4)
}
  0xf7   :  { %317 = dma.vmem_to_hbm [thread:$0]  %s315_s3, 512, %s454_s4, [#allocation3]  }
  0xf8   :  { %362 = dma.done.wait [#allocation3], 512  }
  0xf9   :  { %363 = vsyncadd [#allocation3], 4294966784 }
  0xfa   :  { %321 = vsyncpa [#allocation3], 1 }

</bundles_post_ra>
